<compile_context>
chip_gen: v7x
topology: tpu7x:2x2x1
jax: 0.10.0
libtpu: 0.0.40
codegen_flags: <defaults>
</compile_context>

<pallas_src>
import functools

import jax
import jax.numpy as jnp
from jax import lax
from jax.experimental import pallas as pl
from jax.experimental.pallas import tpu as pltpu

NEG_SLOPE = 0.2        # PyG GATConv default leaky_relu slope
MASK_BIAS = -1e9       # additive bias for non-edges
LANE = 128
SUBLANE = 8


def _round_up(v, m):
    return (v + m - 1) // m * m


def _clamp_vmem(est_bytes):
    # generous floor (covers small problems), ceiling below physical VMEM.
    return int(min(max(est_bytes, 32 << 20), 112 << 20))


# ----------------------------------------------------------------------------
# Phase 1: projection kernel  x @ [W | W@A | Wsk]  -> xsrc(bf16), att, skip+bias
# ----------------------------------------------------------------------------
def _proj_kernel(x_ref, w_ref, bias_ref, xsrc_ref, att_ref, skipb_ref, *,
                 hc, hc_pad, a_pad):
    res = jnp.dot(x_ref[...], w_ref[...], preferred_element_type=jnp.float32)
    xw = res[:, :hc_pad]                                   # x' columns
    col = lax.broadcasted_iota(jnp.int32, xw.shape, 1)
    # ones column at col hc -> softmax denominator comes out of the MXU in phase 2
    xsrc_ref[...] = jnp.where(col == hc, 1.0, xw).astype(jnp.bfloat16)
    att_ref[...] = res[:, hc_pad:hc_pad + a_pad]           # a_src | a_dst scalars
    skipb_ref[...] = res[:, hc_pad + a_pad:] + bias_ref[...]   # skip + folded biases


def _project(x, wcomb, bias, *, hc, hc_pad, a_pad, out_pad, tile):
    n, fpad = x.shape
    tot_pad = wcomb.shape[1]
    est = (fpad * tot_pad * 4 + out_pad * 4                       # resident weights
           + 2 * tile * (fpad * 4 + hc_pad * 2 + a_pad * 4 + out_pad * 4)
           + 4 * tile * tot_pad * 4)                              # live values
    return pl.pallas_call(
        functools.partial(_proj_kernel, hc=hc, hc_pad=hc_pad, a_pad=a_pad),
        grid=(n // tile,),
        in_specs=[
            pl.BlockSpec((tile, fpad), lambda p: (p, 0)),
            pl.BlockSpec((fpad, tot_pad), lambda p: (0, 0),
                         pipeline_mode=pl.Buffered(1)),           # resident weight
            pl.BlockSpec((1, out_pad), lambda p: (0, 0),
                         pipeline_mode=pl.Buffered(1)),           # resident bias
        ],
        out_specs=(
            pl.BlockSpec((tile, hc_pad), lambda p: (p, 0)),
            pl.BlockSpec((tile, a_pad), lambda p: (p, 0)),
            pl.BlockSpec((tile, out_pad), lambda p: (p, 0)),
        ),
        out_shape=(
            jax.ShapeDtypeStruct((n, hc_pad), jnp.bfloat16),
            jax.ShapeDtypeStruct((n, a_pad), jnp.float32),
            jax.ShapeDtypeStruct((n, out_pad), jnp.float32),
        ),
        compiler_params=pltpu.CompilerParams(
            dimension_semantics=("parallel",),
            vmem_limit_bytes=_clamp_vmem(2 * est)),
    )(x, wcomb, bias)


# ----------------------------------------------------------------------------
# Phase 2: attention / aggregation / skip / activation kernel (dst-tiled)
# ----------------------------------------------------------------------------
def _attn_kernel(adj_ref, xsrc_ref, avt_ref, att_ref, skipb_ref, *rest,
                 heads, c, hc, hc_pad, adst_off, out_dim, out_pad, last):
    if last:
        fold_ref, o_ref = rest
    else:
        (o_ref,) = rest
    t = o_ref.shape[0]

    # int8 0/1 mask -> additive bias (0 edge / -1e9 non-edge), no select needed
    adj_bias = (adj_ref[...].astype(jnp.float32) - 1.0) * jnp.float32(-MASK_BIAS)
    xsrc = xsrc_ref[...]                                   # (N, HC_PAD) bf16, resident
    col = lax.broadcasted_iota(jnp.int32, (t, hc_pad), 1)

    conv = jnp.zeros((t, hc_pad), jnp.float32)             # register accumulator
    for h in range(heads):                                 # unrolled at trace time
        a_src = avt_ref[h:h + 1, :]                        # (1, N) resident row
        a_dst = att_ref[:, adst_off + h:adst_off + h + 1]  # (T, 1) streamed col
        e = a_dst + a_src                                  # (T, N)
        e = jnp.maximum(e, NEG_SLOPE * e) + adj_bias       # leaky_relu + mask
        m = jnp.max(e, axis=1, keepdims=True)
        p = jnp.exp(e - m).astype(jnp.bfloat16)            # unnormalized alpha
        # [agg_all_heads | rowsum] in one MXU matmul (ones column at col hc)
        res = jnp.dot(p, xsrc, preferred_element_type=jnp.float32)   # (T, HC_PAD)
        inv = pl.reciprocal(res[:, hc:hc + 1], approx=True)          # 1 / softmax denom
        scale = jnp.where((col >= h * c) & (col < (h + 1) * c), inv, 0.0)
        conv = conv + res * scale                          # keep only head h's cols

    if last:
        # head-mean + column alignment as one small constant matmul (idle MXU)
        mean = jnp.dot(conv.astype(jnp.bfloat16), fold_ref[...],
                       preferred_element_type=jnp.float32)
        y = mean + skipb_ref[...]                          # + skip + biases
        lane = lax.broadcasted_iota(jnp.int32, y.shape, 1)
        y = jnp.where(lane < out_dim, y, MASK_BIAS)        # exclude pad lanes
        mx = jnp.max(y, axis=-1, keepdims=True)
        z = y - mx
        lse = jnp.log(jnp.sum(jnp.exp(z), axis=-1, keepdims=True))
        o_ref[...] = z - lse                               # log_softmax
    else:
        y = conv[:, :out_pad] + skipb_ref[...]             # concat heads + skip + biases
        o_ref[...] = jnp.where(y > 0, y, jnp.expm1(y))     # ELU (alpha=1)


def _attention(adj_mask, xsrc, avt, att, skipb, fold, *, heads, c, hc, hc_pad,
               adst_off, at_rows, out_dim, out_pad, last, tile):
    n = adj_mask.shape[0]
    a_pad = att.shape[1]
    kernel = functools.partial(
        _attn_kernel, heads=heads, c=c, hc=hc, hc_pad=hc_pad,
        adst_off=adst_off, out_dim=out_dim, out_pad=out_pad, last=last)

    in_specs = [
        pl.BlockSpec((tile, n), lambda i: (i, 0)),                  # int8 adj stream
        pl.BlockSpec((n, hc_pad), lambda i: (0, 0),
                     pipeline_mode=pl.Buffered(1)),                 # resident bf16 x'
        pl.BlockSpec((at_rows, n), lambda i: (0, 0),
                     pipeline_mode=pl.Buffered(1)),                 # resident a_src^T
        pl.BlockSpec((tile, a_pad), lambda i: (i, 0)),              # a_dst dst tile
        pl.BlockSpec((tile, out_pad), lambda i: (i, 0)),            # skip+bias dst tile
    ]
    args = [adj_mask, xsrc, avt, att, skipb]
    if last:
        in_specs.append(pl.BlockSpec((hc_pad, out_pad), lambda i: (0, 0),
                                     pipeline_mode=pl.Buffered(1)))  # head-mean fold
        args.append(fold)

    resident = n * hc_pad * 2 + at_rows * n * 4 + (hc_pad * out_pad * 2 if last else 0)
    streamed = 2 * tile * (n + a_pad * 4 + 2 * out_pad * 4)
    live = 8 * tile * n * 4                                          # e/p/bias values
    return pl.pallas_call(
        kernel,
        grid=(n // tile,),
        in_specs=in_specs,
        out_specs=pl.BlockSpec((tile, out_pad), lambda i: (i, 0)),
        out_shape=jax.ShapeDtypeStruct((n, out_pad), jnp.float32),
        compiler_params=pltpu.CompilerParams(
            dimension_semantics=("parallel",),
            vmem_limit_bytes=_clamp_vmem(resident + streamed + live)),
    )(*args)


# ----------------------------------------------------------------------------
# Layer / model wrappers
# ----------------------------------------------------------------------------
def prepare_layers(params, in_channels, hidden_channels, out_channels,
                   num_layers, heads):
    """Pad & fuse weights: wcomb = [W | W@A_src | W@A_dst | W_skip], fold biases."""
    layers = []
    fin_real = in_channels
    for i, p in enumerate(params):
        last = i == num_layers - 1
        c = out_channels if last else hidden_channels
        hc = heads * c
        out_dim = out_channels if last else heads * hidden_channels
        fpad = _round_up(fin_real, LANE)
        at_rows = _round_up(heads, SUBLANE)
        adst_off = at_rows
        a_pad = _round_up(adst_off + heads, LANE)
        hc_pad = _round_up(hc + 1, LANE)          # +1 for the ones column
        out_pad = _round_up(out_dim, LANE)
        tot_pad = hc_pad + a_pad + out_pad

        w = p["w"]                                          # (fin, H*C)
        # block-diagonal [a_src | a_dst]: all 2H attention projections = one matmul
        A = jnp.zeros((hc, 2 * heads), jnp.float32)
        for h in range(heads):
            A = A.at[h * c:(h + 1) * c, h].set(p["asrc"][h])
            A = A.at[h * c:(h + 1) * c, heads + h].set(p["adst"][h])
        wa = w @ A                                          # (fin, 2H)

        wcomb = jnp.zeros((fpad, tot_pad), jnp.float32)
        wcomb = wcomb.at[:fin_real, :hc].set(w)
        wcomb = wcomb.at[:fin_real, hc_pad:hc_pad + heads].set(wa[:, :heads])
        wcomb = wcomb.at[:fin_real,
                         hc_pad + adst_off:hc_pad + adst_off + heads].set(wa[:, heads:])
        wcomb = wcomb.at[:fin_real,
                         hc_pad + a_pad:hc_pad + a_pad + out_dim].set(p["wsk"])
        bias = jnp.zeros((1, out_pad), jnp.float32)
        bias = bias.at[:, :out_dim].set(p["b"] + p["bsk"])  # conv bias + skip bias

        fold = None
        if last:  # (HC_PAD, OUT_PAD) constant: aligns head blocks + mean over heads
            foldm = jnp.zeros((hc_pad, out_pad), jnp.float32)
            for h in range(heads):
                foldm = foldm.at[h * c:(h + 1) * c, :c].set(jnp.eye(c) / heads)
            fold = foldm.astype(jnp.bfloat16)

        layers.append(dict(wcomb=wcomb, bias=bias, fold=fold, c=c, hc=hc,
                           hc_pad=hc_pad, a_pad=a_pad, adst_off=adst_off,
                           at_rows=at_rows, out_dim=out_dim, out_pad=out_pad,
                           last=last))
        fin_real = out_dim
    return layers


def gat_forward(x, adj_mask, layers, *, heads, tile_dst, tile_proj):
    for lp in layers:
        xsrc, att, skipb = _project(x, lp["wcomb"], lp["bias"], hc=lp["hc"],
                                    hc_pad=lp["hc_pad"], a_pad=lp["a_pad"],
                                    out_pad=lp["out_pad"], tile=tile_proj)
        # a_src as lane-dense rows over N (tiny XLA transpose of 8 columns)
        avt = jnp.transpose(att[:, :lp["at_rows"]])
        x = _attention(adj_mask, xsrc, avt, att, skipb, lp["fold"],
                       heads=heads, c=lp["c"], hc=lp["hc"], hc_pad=lp["hc_pad"],
                       adst_off=lp["adst_off"], at_rows=lp["at_rows"],
                       out_dim=lp["out_dim"], out_pad=lp["out_pad"],
                       last=lp["last"], tile=tile_dst)
    return x


def gat_apply(x, adj, params, *, in_channels, hidden_channels, out_channels,
              num_layers, heads, tile_dst=128, tile_proj=128):
    # tile_dst/tile_proj = 256 is preferable on v6e (128 MiB VMEM, 256-wide MXU).
    n_real, f_real = x.shape
    n_pad = _round_up(n_real, max(tile_dst, tile_proj))
    assert n_pad % tile_dst == 0 and n_pad % tile_proj == 0
    f_pad = _round_up(f_real, LANE)

    x_pad = jnp.zeros((n_pad, f_pad), jnp.float32).at[:n_real, :f_real].set(x)
    # int8 0/1 adjacency mask (adj[dst, src]); padded rows/cols = 0 (non-edge).
    adj_mask = jnp.zeros((n_pad, n_pad), jnp.int8).at[:n_real, :n_real].set(
        (adj > 0).astype(jnp.int8))

    layers = prepare_layers(params, in_channels, hidden_channels, out_channels,
                            num_layers, heads)
    out = gat_forward(x_pad, adj_mask, layers, heads=heads,
                      tile_dst=tile_dst, tile_proj=tile_proj)
    # padded dst rows see an all-masked softmax (garbage but finite) — sliced off here
    return out[:n_real, :out_channels]


# ----------------------------------------------------------------------------
# Deterministic parameter construction (glorot-uniform style)
# ----------------------------------------------------------------------------
def _glorot(key, shape):
    fan_in, fan_out = shape[0], shape[-1]
    limit = (6.0 / (fan_in + fan_out)) ** 0.5
    return jax.random.uniform(key, shape, jnp.float32, -limit, limit)


def make_params(key, in_channels, hidden_channels, out_channels, num_layers, heads):
    params = []
    dims_in = [in_channels] + [heads * hidden_channels] * (num_layers - 1)
    for i in range(num_layers):
        last = i == num_layers - 1
        c = out_channels if last else hidden_channels
        fin = dims_in[i]
        conv_out = heads * c
        skip_out = out_channels if last else heads * hidden_channels
        bias_dim = c if last else heads * c
        key, k1, k2, k3, k4, k5 = jax.random.split(key, 6)
        params.append(dict(
            w=_glorot(k1, (fin, conv_out)),
            asrc=_glorot(k2, (heads, c)),
            adst=_glorot(k3, (heads, c)),
            b=jnp.zeros((1, bias_dim), jnp.float32),
            wsk=_glorot(k4, (fin, skip_out)),
            bsk=0.01 * jax.random.normal(k5, (1, skip_out), jnp.float32),
        ))
    return params


# ----------------------------------------------------------------------------
# Pure-JAX reference (fp32) for a loose numerical cross-check
# ----------------------------------------------------------------------------
def _reference(x, adj, params, *, hidden, out_ch, num_layers, heads):
    h = x
    mask = jnp.where(adj > 0, 0.0, MASK_BIAS)
    for i, p in enumerate(params):
        last = i == num_layers - 1
        c = out_ch if last else hidden
        xp = (h @ p["w"]).reshape(-1, heads, c)
        asrc = jnp.einsum("nhc,hc->nh", xp, p["asrc"])
        adst = jnp.einsum("nhc,hc->nh", xp, p["adst"])
        e = adst[:, None, :] + asrc[None, :, :]          # (dst, src, head)
        e = jnp.where(e > 0, e, NEG_SLOPE * e) + mask[:, :, None]
        alpha = jax.nn.softmax(e, axis=1)
        conv = jnp.einsum("dsh,shc->dhc", alpha, xp)
        if last:
            conv = conv.mean(axis=1) + p["b"][0]
        else:
            conv = conv.reshape(-1, heads * c) + p["b"][0]
        y = conv + h @ p["wsk"] + p["bsk"][0]
        h = y if last else jax.nn.elu(y)
    return jax.nn.log_softmax(h, axis=-1)


# ----------------------------------------------------------------------------
if __name__ == "__main__":
    IN_CHANNELS = 64
    HIDDEN_CHANNELS = 16
    OUT_CHANNELS = 16
    NUM_LAYERS = 3
    HEADS = 4
    N_NODES = 256
    N_EDGES = 1024

    key = jax.random.PRNGKey(0)
    kx, ke1, ke2, kp = jax.random.split(key, 4)

    x = jax.random.normal(kx, (N_NODES, IN_CHANNELS), jnp.float32)
    src = jax.random.randint(ke1, (N_EDGES,), 0, N_NODES)
    dst = jax.random.randint(ke2, (N_EDGES,), 0, N_NODES)
    # edge_index (2, E) -> dense adjacency mask adj[dst, src] = 1, plus self-loops
    adj = jnp.zeros((N_NODES, N_NODES), jnp.float32).at[dst, src].set(1.0)
    adj = jnp.maximum(adj, jnp.eye(N_NODES, dtype=jnp.float32))

    params = make_params(kp, IN_CHANNELS, HIDDEN_CHANNELS, OUT_CHANNELS,
                         NUM_LAYERS, HEADS)

    out = gat_apply(x, adj, params,
                    in_channels=IN_CHANNELS, hidden_channels=HIDDEN_CHANNELS,
                    out_channels=OUT_CHANNELS, num_layers=NUM_LAYERS,
                    heads=HEADS, tile_dst=128, tile_proj=128)
    out = jax.block_until_ready(out)
    assert out.shape == (N_NODES, OUT_CHANNELS)
    assert bool(jnp.all(jnp.isfinite(out)))

    # loose tolerance: bf16 alpha/x' aggregation + approx reciprocal vs fp32 ref
    ref = _reference(x, adj, params, hidden=HIDDEN_CHANNELS, out_ch=OUT_CHANNELS,
                     num_layers=NUM_LAYERS, heads=HEADS)
    err = float(jnp.max(jnp.abs(out - ref)))
    assert err < 0.5, f"kernel vs reference mismatch: {err}"
    print("KERNEL_OK")
</pallas_src>

<mosaic_0001>
module attributes {stable_mosaic.version = 11 : i64} {
  func.func @_proj_kernel(%arg0: i32, %arg1: memref<128x128xf32, #tpu.memory_space<vmem>>, %arg2: memref<128x384xf32, #tpu.memory_space<vmem>>, %arg3: memref<1x128xf32, #tpu.memory_space<vmem>>, %arg4: memref<128x128xbf16, #tpu.memory_space<vmem>>, %arg5: memref<128x128xf32, #tpu.memory_space<vmem>>, %arg6: memref<128x128xf32, #tpu.memory_space<vmem>>) attributes {dimension_semantics = [#tpu.dimension_semantics<parallel>], iteration_bounds = array<i64: 2>, scalar_prefetch = 0 : i64, scratch_operands = 0 : i64, tpu.core_type = #tpu.core_type<tc>, window_params = [{transform_indices = @transform_0, window_bounds = array<i64: 128, 128>}, {pipeline_mode = #tpu.pipeline_mode<synchronous>, transform_indices = @transform_1, window_bounds = array<i64: 128, 384>}, {pipeline_mode = #tpu.pipeline_mode<synchronous>, transform_indices = @transform_2, window_bounds = array<i64: 1, 128>}, {transform_indices = @transform_3, window_bounds = array<i64: 128, 128>}, {transform_indices = @transform_4, window_bounds = array<i64: 128, 128>}, {transform_indices = @transform_5, window_bounds = array<i64: 128, 128>}]} {
    %c0 = arith.constant 0 : index
    %c0_0 = arith.constant 0 : index
    %0 = vector.load %arg1[%c0, %c0_0] : memref<128x128xf32, #tpu.memory_space<vmem>>, vector<128x128xf32>
    %c0_1 = arith.constant 0 : index
    %c0_2 = arith.constant 0 : index
    %1 = vector.load %arg2[%c0_1, %c0_2] : memref<128x384xf32, #tpu.memory_space<vmem>>, vector<128x384xf32>
    %cst = arith.constant dense<0.000000e+00> : vector<128x384xf32>
    %2 = tpu.matmul %0, %1, %cst {dimension_numbers = #tpu.dot_dimension_numbers<[1], [0], [0], [1], [0, 0, 1, 1], [], []>} : vector<128x128xf32>, vector<128x384xf32>, vector<128x384xf32> -> vector<128x384xf32>
    %3 = vector.extract_strided_slice %2 {offsets = [0, 0], sizes = [128, 128], strides = [1, 1]} : vector<128x384xf32> to vector<128x128xf32>
    %4 = tpu.iota {dimensions = array<i32: 1>} : vector<128x128xi32>
    %c64_i32 = arith.constant 64 : i32
    %5 = vector.broadcast %c64_i32 : i32 to vector<128x128xi32>
    %6 = arith.cmpi eq, %4, %5 : vector<128x128xi32>
    %cst_3 = arith.constant 1.000000e+00 : f32
    %7 = vector.broadcast %cst_3 : f32 to vector<128x128xf32>
    %8 = arith.select %6, %7, %3 : vector<128x128xi1>, vector<128x128xf32>
    %9 = arith.truncf %8 : vector<128x128xf32> to vector<128x128xbf16>
    %c0_4 = arith.constant 0 : index
    %c0_5 = arith.constant 0 : index
    %10 = vector.load %arg4[%c0_4, %c0_5] : memref<128x128xbf16, #tpu.memory_space<vmem>>, vector<128x128xbf16>
    tpu.vector_store %arg4[%c0_4, %c0_5], %9 {strides = array<i32>} : memref<128x128xbf16, #tpu.memory_space<vmem>>, vector<128x128xbf16>,
    %11 = vector.extract_strided_slice %2 {offsets = [0, 128], sizes = [128, 128], strides = [1, 1]} : vector<128x384xf32> to vector<128x128xf32>
    %c0_6 = arith.constant 0 : index
    %c0_7 = arith.constant 0 : index
    %12 = vector.load %arg5[%c0_6, %c0_7] : memref<128x128xf32, #tpu.memory_space<vmem>>, vector<128x128xf32>
    tpu.vector_store %arg5[%c0_6, %c0_7], %11 {strides = array<i32>} : memref<128x128xf32, #tpu.memory_space<vmem>>, vector<128x128xf32>,
    %13 = vector.extract_strided_slice %2 {offsets = [0, 256], sizes = [128, 128], strides = [1, 1]} : vector<128x384xf32> to vector<128x128xf32>
    %c0_8 = arith.constant 0 : index
    %c0_9 = arith.constant 0 : index
    %14 = vector.load %arg3[%c0_8, %c0_9] : memref<1x128xf32, #tpu.memory_space<vmem>>, vector<1x128xf32>
    %15 = vector.broadcast %14 : vector<1x128xf32> to vector<128x128xf32>
    %16 = arith.addf %13, %15 : vector<128x128xf32>
    %c0_10 = arith.constant 0 : index
    %c0_11 = arith.constant 0 : index
    %17 = vector.load %arg6[%c0_10, %c0_11] : memref<128x128xf32, #tpu.memory_space<vmem>>, vector<128x128xf32>
    tpu.vector_store %arg6[%c0_10, %c0_11], %16 {strides = array<i32>} : memref<128x128xf32, #tpu.memory_space<vmem>>, vector<128x128xf32>,
    return
  }
  func.func @transform_0(%arg0: i32) -> (i32, i32) {
    %c0_i32 = arith.constant 0 : i32
    %c0_i32_0 = arith.constant 0 : i32
    return %arg0, %c0_i32 : i32, i32
  }
  func.func @transform_1(%arg0: i32) -> (i32, i32) {
    %c0_i32 = arith.constant 0 : i32
    %c0_i32_0 = arith.constant 0 : i32
    %c0_i32_1 = arith.constant 0 : i32
    return %c0_i32, %c0_i32_0 : i32, i32
  }
  func.func @transform_2(%arg0: i32) -> (i32, i32) {
    %c0_i32 = arith.constant 0 : i32
    %c0_i32_0 = arith.constant 0 : i32
    %c0_i32_1 = arith.constant 0 : i32
    return %c0_i32, %c0_i32_0 : i32, i32
  }
  func.func @transform_3(%arg0: i32) -> (i32, i32) {
    %c0_i32 = arith.constant 0 : i32
    %c0_i32_0 = arith.constant 0 : i32
    return %arg0, %c0_i32 : i32, i32
  }
  func.func @transform_4(%arg0: i32) -> (i32, i32) {
    %c0_i32 = arith.constant 0 : i32
    %c0_i32_0 = arith.constant 0 : i32
    return %arg0, %c0_i32 : i32, i32
  }
  func.func @transform_5(%arg0: i32) -> (i32, i32) {
    %c0_i32 = arith.constant 0 : i32
    %c0_i32_0 = arith.constant 0 : i32
    return %arg0, %c0_i32 : i32, i32
  }
}

</mosaic_0001>

<bundles_post_ra>
// kernel: tpu_custom_call.1
= control target key start
LH: loop header
LB: loop body
LE: loop exit
PB: predicated region body
PF: predicated region fallthrough
CT: control target
= control target key end

     0   :  { %s1996_s0 = inlined_call_operand.hbm [shape: f32[256,128], index: 0, kind: input, shape index: {}]   ;;  %s1997_s1 = inlined_call_operand.hbm [shape: f32[128,384], index: 1, kind: input, shape index: {}]   ;;  %s1998_s2 = inlined_call_operand.vmem [shape: f32[1,128], index: 2, kind: input, shape index: {}]   ;;  %s1999_s3 = inlined_call_operand.hbm [shape: bf16[256,128], index: 3, kind: output, shape index: {0}]   ;;  %s2000_s4 = inlined_call_operand.hbm [shape: f32[256,128], index: 4, kind: output, shape index: {1}]   ;;  %s2001_s5 = inlined_call_operand.hbm [shape: f32[256,128], index: 5, kind: output, shape index: {2}]  }
   0x1   :  { %2006 = sst [smem:[#allocation15_spill]] %s1996_s0 }
   0x2   :  { %11 = vsyncpa [#allocation3], 0 }
   0x3   :  { %13 = vsyncpa [#allocation3 + $0x1], 0 }
   0x4   :  { %14 = vsyncpa [#allocation6], 0 }
   0x5   :  { %15 = vsyncpa [#allocation4], 0 }
   0x6   :  { %17 = vsyncpa [#allocation4 + $0x1], 0 }
   0x7   :  { %18 = vsyncpa [#allocation9], 0 }
   0x8   :  { %20 = vsyncpa [#allocation9 + $0x1], 0  ;;  %s1574_s18 = smov 0   ;;  %s1576_s19 = smov 0  }
   0x9   :  { %s1578_s20 = smov 0   ;;  %s1580_s21 = smov 0  }
   0xa LB: > { %s1595_s22 = sadd.s32 4294967295, %s1528_s21   ;;  %s2005_s23 = sadd.s32 4294967294, %s1528_s21   ;;  %s1528_s21 = sphi %s1580_s21, %s2025_s21   ;;  %s1524_s20 = sphi %s1578_s20, %s2024_s20   ;;  %s1520_s19 = sphi %s1576_s19, %s2023_s19   ;;  %s1516_s18 = sphi %s1574_s18, %s2022_s18  }
   0xb   : > { %p46_p0 = scmp.ne.s32.totalorder %s1520_s19, %s1516_s18  ;;  %p2002_p1 = scmp.eq.s32.totalorder %s1595_s22, 0 }
   0xc   : > { %p118_p3 = scmp.eq.s32.totalorder %s2005_s23, 1  ;;  %p1005_p5 = scmp.ge.s32.totalorder %s1528_s21, 1 }
   0xd   : > { %p1606_p4 = por %p2002_p1, %p46_p0  ;;  %p177_p7 = scmp.lt.s32.totalorder %s1528_s21, 3 }
   0xe   : > { %p1611_p6 = por %p118_p3, %p46_p0  ;;  %s1530_s27 = smov [#allocation5]  }
   0xf   : > { %s2007_s24 = scalar_select %p1606_p4, 1, 0 }
  0x10   : > { %s2008_s25 = scalar_select %p1611_p6, 1, 0 }
  0x11   : > { %p1616_p8 = pnand %p1005_p5, %p177_p7  ;;  %s189_s28 = sshll.u32 %s1530_s27, 4  ;;  %s1620_s28 = int_to_ptr.vmem [resolvable:$true] %s189_s28 }
  0x12   : > { %s1632_s30 = sadd.s32 1, %s1528_s21   ;;  %s33_s6 = sadd.s32 1, %s1524_s20 }
  0x13   : > { %s2009_s26 = scalar_select %p1616_p8, 1, 0 }
  0x14   : > { %p1276_p9 = pneg %p1616_p8  ;;  %s30_s7 = ssub.s32 %s1528_s21, %s1632_s30 }
  0x15   : > { %s1340_s10 = scalar_lea.hbm %s1997_s1, 6144 }
  0x16   : > { %p1627_p11 = pnand %p1276_p9, %p2002_p1  ;;  %p1341_p12 = scmp.ne.s32.totalorder %s1997_s1, %s1340_s10 }
  0x17   : > { %p1347_p5 = scmp.lt.u32.totalorder %s1340_s10, %s1997_s1 }
  0x18   : > { %p1342_p13 = pneg %p1627_p11 }
  0x1a   : > { %p1343_p0 = pnand %p1342_p13, %p1341_p12 }
  0x1c   : > { %p1344_p3 = pneg %p1343_p0 }
  0x1e   : > { %p1349_p7 = pnand %p1347_p5, %p1344_p3 }
  0x20   : > { %1352 = shalt.err (!%p1349_p7)
}
  0x21   : > { %s1353_s15 = scalar_lea.vmem %s1620_s28, 6144  ;;  %p1361_p2 = scmp.lt.s32.totalorder %s1620_s28, %s1620_s28 }
  0x22   : > { %p1354_p9 = scmp.ne.s32.totalorder %s1620_s28, %s1353_s15  ;;  %p1362_p6 = scmp.lt.s32.totalorder %s1353_s15, %s1353_s15 }
  0x24   : > { %p1356_p10 = pnand %p1354_p9, %p1342_p13  ;;  %p1363_p4 = por %p1362_p6, %p1361_p2 }
  0x26   : > { %p1357_p1 = pneg %p1356_p10 }
  0x28   : > { %p1364_p8 = pnand %p1363_p4, %p1357_p1 }
  0x2a   : > { %1367 = shalt.err (!%p1364_p8)
}
  0x2b   : > { %s1531_s16 = smov 384   ;;  %s1532_s17 = smov 24  }
  0x2c   : > { %1279 = dma.hbm_to_vmem [thread:$0]  (!%p1627_p11), %s1997_s1, 6144, %s1620_s28, [#allocation6], %s1531_s16, %s1531_s16, %s1532_s17  }
  0x2d   : > { %p31_p2 = scmp.eq.s32.totalorder %s30_s7, 0  ;;  %p40_p1 = scmp.ne.s32.totalorder %s1524_s20, %s1520_s19 }
  0x2e   : > { %p41_p4 = scmp.eq.s32.totalorder %s1528_s21, 0  ;;  %p1295_p6 = scmp.lt.s32.totalorder %s1528_s21, 2 }
  0x2f   : > { %s1663_s9 = scalar_select %p31_p2, %s1524_s20, %s33_s6  }
  0x30   : > { %p42_p8 = por %p41_p4, %p40_p1  ;;  %p2011_p10 = scmp.eq.s32.totalorder %s1595_s22, 1 }
  0x31   : > { %s206_s11 = sand.u32 1, %s1524_s20   ;;  %s1045_s12 = sshll.u32 %s1528_s21, 11 }
  0x32   : > { %p1667_p12 = por %p2011_p10, %p40_p1  ;;  %s1008_s13 = sshll.u32 %s206_s11, 7 }
  0x33   : > { %s2013_s0 = sld [smem:[#allocation15_spill]]  ;;  %s210_s28 = scalar_lea.vmem [#allocation2], %s1008_s13 }
  0x34   : > { %s217_s6 = sshll.u32 %s210_s28, 4  ;;  %p1678_p11 = pnand %p1295_p6, %p42_p8  ;;  %s1682_s6 = int_to_ptr.vmem [resolvable:$true] %s217_s6 }
  0x35   : > { %s1684_s16 = scalar_lea.sflag [#allocation3], %s206_s11 }
  0x36   : > { %p1370_p0 = pneg %p1678_p11 }
  0x39   : > { %s1676_s15 = scalar_lea.hbm %s2013_s0, %s1045_s12  ;;  %s1373_s12 = scalar_lea.hbm %s2013_s0, 4096 }
  0x3a   : > { %s1368_s17 = scalar_lea.hbm %s1676_s15, 2048  ;;  %p1374_p7 = scmp.lt.u32.totalorder %s1676_s15, %s2013_s0 }
  0x3b   : > { %p1369_p13 = scmp.ne.s32.totalorder %s1676_s15, %s1368_s17  ;;  %p1375_p9 = scmp.lt.u32.totalorder %s1373_s12, %s1368_s17 }
  0x3c   : > { %p1377_p1 = scmp.lt.u32.totalorder %s1368_s17, %s1676_s15 }
  0x3d   : > { %p1371_p3 = pnand %p1370_p0, %p1369_p13  ;;  %p1376_p2 = por %p1375_p9, %p1374_p7 }
  0x3f   : > { %p1372_p5 = pneg %p1371_p3  ;;  %p1378_p4 = por %p1377_p1, %p1376_p2 }
  0x41   : > { %p1379_p6 = pnand %p1378_p4, %p1372_p5 }
  0x43   : > { %1382 = shalt.err (!%p1379_p6)
}
  0x44   : > { %s1383_s11 = scalar_lea.vmem %s1682_s6, 2048  ;;  %s1533_s14 = smov [#allocation2]  }
  0x45   : > { %p1384_p8 = scmp.ne.s32.totalorder %s1682_s6, %s1383_s11  ;;  %s1388_s28 = sshll.u32 %s1533_s14, 4  ;;  %s1389_s28 = int_to_ptr.vmem [resolvable:$false] %s1388_s28 }
  0x46   : > { %s1390_s27 = scalar_lea.vmem %s1389_s28, 4096  ;;  %p1391_p3 = scmp.lt.s32.totalorder %s1682_s6, %s1389_s28 }
  0x47   : > { %p1386_p10 = pnand %p1384_p8, %p1370_p0  ;;  %p1392_p7 = scmp.lt.s32.totalorder %s1390_s27, %s1383_s11 }
  0x49   : > { %p1387_p13 = pneg %p1386_p10  ;;  %p1393_p9 = por %p1392_p7, %p1391_p3 }
  0x4b   : > { %p1394_p2 = pnand %p1393_p9, %p1387_p13 }
  0x4d   : > { %1397 = shalt.err (!%p1394_p2)
}
  0x4e   : > { %s1534_s17 = smov 128   ;;  %s1535_s8 = smov 8  }
  0x4f   : > { %1283 = dma.hbm_to_vmem [thread:$0]  (!%p1678_p11), %s1676_s15, 2048, %s1682_s6, %s1684_s16, %s1534_s17, %s1534_s17, %s1535_s8  }
  0x50   : > { %p2015_p0 = scmp.ne.s32.totalorder %s2009_s26, 0 }
  0x51   : > { %s1715_s12 = sand.u32 (!%p2015_p0), 1, %s1520_s19   ;;  %p2016_p5 = scmp.ne.s32.totalorder (!%p2015_p0), %s2007_s24, 0 }
  0x52   : > { %229 = sbr.rel (%p2015_p0) target bundleno = 462 (0x1ce), region = 32  ;;  %s1718_s13 = sshll.u32 (!%p2015_p0), %s1715_s12, 7 }
  0x53   : > { %s232_s29 = scalar_lea.sflag (!%p2015_p0), [#allocation3], %s1715_s12  ;;  %s1722_s11 = scalar_lea.vmem (!%p2015_p0), [#allocation2], %s1718_s13 }
  0x59   : > { %1499 = dma.done.wait (%p2016_p5), %s232_s29, 2048  }
  0x5a   : > { %1501 = vsyncadd (%p2016_p5), %s232_s29, 4294965248  ;;  %p2017_p11 = scmp.eq.s32.totalorder %s1595_s22, 0 }
  0x5c   : > { %1503 = dma.done.wait (%p2017_p11), [#allocation6], 6144   ;;  %p2018_p1 = pmov %p2017_p11 }
  0x5d   : > { %v1536_v0 = vmov 0.0   ;;  %v297_v1 = vld [vmem:[#allocation5 + $0x8] sm:$0xff]  ;;  %v300_v2 = vld [vmem:[#allocation5 + $0x20] sm:$0xff]  ;;  %v299_v5 = vld [vmem:[#allocation5 + $0x18] sm:$0xff]  ;;  %s1772_s24 = scalar_lea.vmem [#allocation8], %s1718_s13  ;;  %s1014_s26 = sshll.u32 %s1715_s12, 6 }
  0x5e   : > { %1505 = vsyncadd (%p2018_p1), [#allocation6], 4294961152  ;;  %408 = vmatprep.mubr.f32.mxu0 %v1536_v0  ;;  %v296_v3 = vld [vmem:[#allocation5] sm:$0xff]  ;;  %v1200_v4 = vpack.c.bf16 %v300_v2, %v297_v1  ;;  %v303_v6 = vld [vmem:[#allocation5 + $0x38] sm:$0xff]  ;;  %s1781_s15 = scalar_lea.vmem [#allocation7], %s1014_s26  ;;  %s1798_s16 = scalar_lea.vmem [#allocation10], %s1718_s13 }
  0x5f   : > { %v306_v7 = vld [vmem:[#allocation5 + $0x50] sm:$0xff]  ;;  %v1202_v8 = vpack.c.bf16 %v299_v5, %v296_v3  ;;  %v305_v11 = vld [vmem:[#allocation5 + $0x48] sm:$0xff]  ;;  %v312_v13 = vld [vmem:[#allocation5 + $0x80] sm:$0xff]  ;;  %s828_s14 = sshll.u32 %s1781_s15, 4  ;;  %s809_s28 = sand.u32 1, %s1595_s22   ;;  %s1869_s14 = int_to_ptr.vmem [resolvable:$true] %s828_s14 }
  0x60   : > { %v1204_v9 = vpack.c.bf16 %v306_v7, %v303_v6  ;;  %v302_v10 = vld [vmem:[#allocation5 + $0x30] sm:$0xff]  ;;  %v309_v12 = vld [vmem:[#allocation5 + $0x68] sm:$0xff]  ;;  %1201 = vmatprep.subr.bf16.mxu0 %v1200_v4  ;;  %v308_v16 = vld [vmem:[#allocation5 + $0x60] sm:$0xff]  ;;  %s1063_s27 = sshll.u32 %s1595_s22, 11  ;;  %s844_s17 = sshll.u32 %s1772_s24, 4  ;;  %s1878_s17 = int_to_ptr.vmem [resolvable:$true] %s844_s17 }
  0x61   : > { %1203 = vmatpush1.bf16.msra.mxu0 %v1202_v8  ;;  %v1206_v14 = vpack.c.bf16 %v305_v11, %v302_v10  ;;  %v1208_v15 = vpack.c.bf16 %v312_v13, %v309_v12  ;;  %v311_v17 = vld [vmem:[#allocation5 + $0x78] sm:$0xff]  ;;  %v318_v19 = vld [vmem:[#allocation5 + $0xb0] sm:$0xff]  ;;  %v317_v23 = vld [vmem:[#allocation5 + $0xa8] sm:$0xff]  ;;  %s1875_s29 = scalar_lea.hbm %s2000_s4, %s1063_s27  ;;  %s1062_s26 = sshll.u32 %s1595_s22, 10 }
  0x62   : > { %1205 = vmatprep.subr.bf16.mxu0 %v1204_v9  ;;  %v315_v18 = vld [vmem:[#allocation5 + $0x98] sm:$0xff]  ;;  %v1210_v20 = vpack.c.bf16 %v311_v17, %v308_v16  ;;  %v314_v22 = vld [vmem:[#allocation5 + $0x90] sm:$0xff]  ;;  %v321_v24 = vld [vmem:[#allocation5 + $0xc8] sm:$0xff]  ;;  %s1885_s23 = scalar_lea.hbm %s2001_s5, %s1063_s27  ;;  %s1897_s8 = scalar_lea.hbm %s1999_s3, %s1062_s26 }
  0x63   : > { %v1212_v21 = vpack.c.bf16 %v318_v19, %v315_v18  ;;  %v324_v25 = vld [vmem:[#allocation5 + $0xe0] sm:$0xff]  ;;  %v298_v26 = vld [vmem:[#allocation5 + $0x10] sm:$0xff]  ;;  %v301_v27 = vld [vmem:[#allocation5 + $0x28] sm:$0xff]  ;;  %v1214_v30 = vpack.c.bf16 %v317_v23, %v314_v22  ;;  %s1899_s13 = scalar_lea.sflag [#allocation9], %s809_s28  ;;  %s1398_s27 = scalar_lea.vmem %s1878_s17, 2048 }
  0x64   : > { %v1734_v28 = vld [vmem:[%s1722_s11] sm:$0xff]  ;;  %v1232_v32 = vpack.c.bf16 %v301_v27, %v298_v26  ;;  %v307_v33 = vld [vmem:[#allocation5 + $0x58] sm:$0xff]  ;;  %v1216_v34 = vpack.c.bf16 %v324_v25, %v321_v24  ;;  %v310_v37 = vld [vmem:[#allocation5 + $0x70] sm:$0xff]  ;;  %v650_v26 = vlaneseq  ;;  %p1399_p4 = scmp.ne.s32.totalorder %s1878_s17, %s1398_s27  ;;  %s1537_s6 = smov [#allocation8]  }
  0x65   : > { %1207 = vmatpush1.bf16.msra.mxu0 %v1206_v14  ;;  %v304_v29 = vld [vmem:[#allocation5 + $0x40] sm:$0xff]  ;;  %1176 = vmatprep.mubr.f32.mxu1 %v1734_v28  ;;  %v323_v35 = vld [vmem:[#allocation5 + $0xd8] sm:$0xff]  ;;  %v313_v38 = vld [vmem:[#allocation5 + $0x88] sm:$0xff]  ;;  %s1402_s7 = sshll.u32 %s1537_s6, 4  ;;  %s1403_s7 = int_to_ptr.vmem [resolvable:$false] %s1402_s7 }
  0x66   : > { %1209 = vmatprep.subr.bf16.mxu0 %v1208_v15  ;;  %v320_v31 = vld [vmem:[#allocation5 + $0xc0] sm:$0xff]  ;;  %v1236_v36 = vpack.c.bf16 %v307_v33, %v304_v29  ;;  %v327_v39 = vld [vmem:[#allocation5 + $0xf8] sm:$0xff]  ;;  %v330_v40 = vld [vmem:[#allocation5 + $0x110] sm:$0xff]  ;;  %1233 = vmatprep.subr.bf16.mxu1 %v1232_v32  ;;  %v1240_v43 = vpack.c.bf16 %v313_v38, %v310_v37  ;;  %v1768_v27 = vand.u32 127, %v650_v26  ;;  %p1400_p6 = pnand %p1399_p4, %p1667_p12  ;;  %s1404_s0 = scalar_lea.vmem %s1403_s7, 4096 }
  0x67   : > { %1235 = vmatpush3.bf16.msra.mxu1 %v1232_v32  ;;  %v1218_v41 = vpack.c.bf16 %v323_v35, %v320_v31  ;;  %v326_v42 = vld [vmem:[#allocation5 + $0xf0] sm:$0xff]  ;;  %v1220_v44 = vpack.c.bf16 %v330_v40, %v327_v39  ;;  %v329_v45 = vld [vmem:[#allocation5 + $0x108] sm:$0xff]  ;;  %v316_v46 = vld [vmem:[#allocation5 + $0xa0] sm:$0xff]  ;;  %p1405_p10 = scmp.lt.s32.totalorder %s1878_s17, %s1403_s7  ;;  %p1406_p13 = scmp.lt.s32.totalorder %s1404_s0, %s1398_s27 }
  0x68   : > { %1237 = vmatprep.subr.bf16.mxu1 %v1236_v36  ;;  %v319_v47 = vld [vmem:[#allocation5 + $0xb8] sm:$0xff]  ;;  %v333_v48 = vld [vmem:[#allocation5 + $0x128] sm:$0xff]  ;;  %v336_v49 = vld [vmem:[#allocation5 + $0x140] sm:$0xff]  ;;  %v1222_v50 = vpack.c.bf16 %v329_v45, %v326_v42  ;;  %vm652_vm0 = vcmp.eq.s32.totalorder %v1768_v27, 64  ;;  %p1401_p8 = pneg %p1400_p6 }
  0x69   : > { %1211 = vmatpush1.bf16.msra.mxu0 %v1210_v20  ;;  %v332_v51 = vld [vmem:[#allocation5 + $0x120] sm:$0xff]  ;;  %v1244_v52 = vpack.c.bf16 %v319_v47, %v316_v46  ;;  %v1224_v53 = vpack.c.bf16 %v336_v49, %v333_v48  ;;  %v335_v54 = vld [vmem:[#allocation5 + $0x138] sm:$0xff]  ;;  %v322_v55 = vld [vmem:[#allocation5 + $0xd0] sm:$0xff]  ;;  %p1407_p3 = por %p1406_p13, %p1405_p10 }
  0x6a   : > { %1213 = vmatprep.subr.bf16.mxu0 %v1212_v21  ;;  %v325_v56 = vld [vmem:[#allocation5 + $0xe8] sm:$0xff]  ;;  %v339_v57 = vld [vmem:[#allocation5 + $0x158] sm:$0xff]  ;;  %v342_v58 = vld [vmem:[#allocation5 + $0x170] sm:$0xff]  ;;  %v1226_v59 = vpack.c.bf16 %v335_v54, %v332_v51 }
  0x6b   : > { %1239 = vmatpush3.bf16.msra.mxu1 %v1236_v36  ;;  %v338_v60 = vld [vmem:[#allocation5 + $0x150] sm:$0xff]  ;;  %v1248_v61 = vpack.c.bf16 %v325_v56, %v322_v55  ;;  %v1228_v62 = vpack.c.bf16 %v342_v58, %v339_v57  ;;  %v341_v63 = vld [vmem:[#allocation5 + $0x168] sm:$0xff]  ;;  %v328_v1 = vld [vmem:[#allocation5 + $0x100] sm:$0xff]  ;;  %p1408_p7 = pnand %p1407_p3, %p1401_p8 }
  0x6c   : > { %1241 = vmatprep.subr.bf16.mxu1 %v1240_v43  ;;  %v331_v2 = vld [vmem:[#allocation5 + $0x118] sm:$0xff]  ;;  %v1230_v3 = vpack.c.bf16 %v341_v63, %v338_v60  ;;  %v334_v5 = vld [vmem:[#allocation5 + $0x130] sm:$0xff]  ;;  %v337_v6 = vld [vmem:[#allocation5 + $0x148] sm:$0xff] }
  0x6d   : > { %1215 = vmatpush1.bf16.msra.mxu0 %v1214_v30  ;;  %v1252_v4 = vpack.c.bf16 %v331_v2, %v328_v1  ;;  %v1256_v7 = vpack.c.bf16 %v337_v6, %v334_v5  ;;  %v340_v8 = vld [vmem:[#allocation5 + $0x160] sm:$0xff]  ;;  %v343_v9 = vld [vmem:[#allocation5 + $0x178] sm:$0xff]  ;;  %v281_v10 = vld [vmem:[%s1722_s11 + $0x8] sm:$0xff] }
  0x6e   : > { %1217 = vmatprep.subr.bf16.mxu0 %v1216_v34  ;;  %v1260_v11 = vpack.c.bf16 %v343_v9, %v340_v8  ;;  %v282_v12 = vld [vmem:[%s1722_s11 + $0x10] sm:$0xff]  ;;  %v283_v13 = vld [vmem:[%s1722_s11 + $0x18] sm:$0xff]  ;;  %v284_v14 = vld [vmem:[%s1722_s11 + $0x20] sm:$0xff] }
  0x6f   : > { %1243 = vmatpush3.bf16.msra.mxu1 %v1240_v43  ;;  %v285_v15 = vld [vmem:[%s1722_s11 + $0x28] sm:$0xff]  ;;  %v286_v16 = vld [vmem:[%s1722_s11 + $0x30] sm:$0xff]  ;;  %v287_v17 = vld [vmem:[%s1722_s11 + $0x38] sm:$0xff] }
  0x70   : > { %1245 = vmatprep.subr.bf16.mxu1 %v1244_v52  ;;  %v288_v18 = vld [vmem:[%s1722_s11 + $0x40] sm:$0xff]  ;;  %v289_v19 = vld [vmem:[%s1722_s11 + $0x48] sm:$0xff]  ;;  %v290_v20 = vld [vmem:[%s1722_s11 + $0x50] sm:$0xff] }
  0x71   : > { %1219 = vmatpush1.bf16.msra.mxu0 %v1218_v41  ;;  %v291_v21 = vld [vmem:[%s1722_s11 + $0x58] sm:$0xff]  ;;  %v292_v22 = vld [vmem:[%s1722_s11 + $0x60] sm:$0xff]  ;;  %v293_v23 = vld [vmem:[%s1722_s11 + $0x68] sm:$0xff] }
  0x72   : > { %1221 = vmatprep.subr.bf16.mxu0 %v1220_v44  ;;  %v294_v24 = vld [vmem:[%s1722_s11 + $0x70] sm:$0xff]  ;;  %v295_v25 = vld [vmem:[%s1722_s11 + $0x78] sm:$0xff]  ;;  %v1787_v36 = vld [vmem:[%s1998_s2] ss:$0 sm:$0xff]  ;;  %s860_s11 = sshll.u32 %s1798_s16, 4  ;;  %s1891_s11 = int_to_ptr.vmem [resolvable:$true] %s860_s11 }
  0x73   : > { %1247 = vmatpush3.bf16.msra.mxu1 %v1244_v52 }
  0x74   : > { %1249 = vmatprep.subr.bf16.mxu1 %v1248_v61 }
  0x75   : > { %1223 = vmatpush1.bf16.msra.mxu0 %v1222_v50 }
  0x76   : > { %1225 = vmatprep.subr.bf16.mxu0 %v1224_v53 }
  0x77   : > { %1251 = vmatpush3.bf16.msra.mxu1 %v1248_v61 }
  0x78   : > { %1253 = vmatprep.subr.bf16.mxu1 %v1252_v4 }
  0x79   : > { %1227 = vmatpush1.bf16.msra.mxu0 %v1226_v59 }
  0x7a   : > { %1229 = vmatprep.subr.bf16.mxu0 %v1228_v62 }
  0x7b   : > { %1255 = vmatpush3.bf16.msra.mxu1 %v1252_v4 }
  0x7c   : > { %1257 = vmatprep.subr.bf16.mxu1 %v1256_v7 }
  0x7d   : > { %1231 = vmatpush1.bf16.msra.mxu0 %v1230_v3 }
  0x7f   : > { %1259 = vmatpush3.bf16.msra.mxu1 %v1256_v7 }
  0x80   : > { %409 = vmatmul.mubr.f32.vlgmr.msra.gmra.mrb[0].mxu0 %v1734_v28  ;;  %1261 = vmatprep.subr.bf16.mxu1 %v1260_v11 }
  0x81   : > { %414 = vmatprep.mubr.f32.mxu0 %v1536_v0 }
  0x83   : > { %1263 = vmatpush3.bf16.msra.mxu1 %v1260_v11 }
  0x84   : > { %415 = vmatmul.mubr.f32.gmra.mrb[2].mxu0 %v281_v10 }
  0x85   : > { %420 = vmatprep.mubr.f32.mxu0 %v1536_v0 }
  0x86   : > { %1177 = vmatmul.mubr.f32.vlgmr.msra.gmra.mrb[0].mxu1 %v281_v10 }
  0x87   : > { %1179 = vmatprep.mubr.f32.mxu1 %v282_v12 }
  0x88   : > { %421 = vmatmul.mubr.f32.gmra.mrb[4].mxu0 %v282_v12 }
  0x89   : > { %426 = vmatprep.mubr.f32.mxu0 %v1536_v0 }
  0x8a   : > { %1180 = vmatmul.mubr.f32.gmra.mrb[2].mxu1 %v283_v13 }
  0x8b   : > { %1182 = vmatprep.mubr.f32.mxu1 %v284_v14 }
  0x8c   : > { %427 = vmatmul.mubr.f32.gmra.mrb[6].mxu0 %v283_v13 }
  0x8d   : > { %432 = vmatprep.mubr.f32.mxu0 %v1536_v0 }
  0x8e   : > { %1183 = vmatmul.mubr.f32.gmra.mrb[4].mxu1 %v285_v15 }
  0x8f   : > { %1185 = vmatprep.mubr.f32.mxu1 %v286_v16 }
  0x90   : > { %433 = vmatmul.mubr.f32.gmra.mrb[8].mxu0 %v284_v14 }
  0x91   : > { %438 = vmatprep.mubr.f32.mxu0 %v1536_v0 }
  0x92   : > { %1186 = vmatmul.mubr.f32.gmra.mrb[6].mxu1 %v287_v17 }
  0x93   : > { %1188 = vmatprep.mubr.f32.mxu1 %v288_v18 }
  0x94   : > { %439 = vmatmul.mubr.f32.gmra.mrb[10].mxu0 %v285_v15 }
  0x95   : > { %444 = vmatprep.mubr.f32.mxu0 %v1536_v0 }
  0x96   : > { %1189 = vmatmul.mubr.f32.gmra.mrb[8].mxu1 %v289_v19 }
  0x97   : > { %1191 = vmatprep.mubr.f32.mxu1 %v290_v20 }
  0x98   : > { %445 = vmatmul.mubr.f32.gmra.mrb[12].mxu0 %v286_v16 }
  0x99   : > { %450 = vmatprep.mubr.f32.mxu0 %v1536_v0 }
  0x9a   : > { %1192 = vmatmul.mubr.f32.gmra.mrb[10].mxu1 %v291_v21 }
  0x9b   : > { %1194 = vmatprep.mubr.f32.mxu1 %v292_v22 }
  0x9c   : > { %451 = vmatmul.mubr.f32.gmra.mrb[14].mxu0 %v287_v17 }
  0x9d   : > { %456 = vmatprep.mubr.f32.mxu0 %v1536_v0 }
  0x9e   : > { %1195 = vmatmul.mubr.f32.gmra.mrb[12].mxu1 %v293_v23 }
  0x9f   : > { %1197 = vmatprep.mubr.f32.mxu1 %v294_v24 }
  0xa0   : > { %457 = vmatmul.mubr.f32.gmra.mrb[16].mxu0 %v288_v18 }
  0xa1   : > { %462 = vmatprep.mubr.f32.mxu0 %v1536_v0 }
  0xa2   : > { %1198 = vmatmul.mubr.f32.gmra.mrb[14].mxu1 %v295_v25 }
  0xa4   : > { %463 = vmatmul.mubr.f32.gmra.mrb[18].mxu0 %v289_v19 }
  0xa5   : > { %468 = vmatprep.mubr.f32.mxu0 %v1536_v0 }
  0xa8   : > { %469 = vmatmul.mubr.f32.gmra.mrb[20].mxu0 %v290_v20 }
  0xa9   : > { %474 = vmatprep.mubr.f32.mxu0 %v1536_v0 }
  0xac   : > { %475 = vmatmul.mubr.f32.gmra.mrb[22].mxu0 %v291_v21 }
  0xad   : > { %480 = vmatprep.mubr.f32.mxu0 %v1536_v0 }
  0xb0   : > { %481 = vmatmul.mubr.f32.gmra.mrb[24].mxu0 %v292_v22 }
  0xb1   : > { %486 = vmatprep.mubr.f32.mxu0 %v1536_v0 }
  0xb4   : > { %487 = vmatmul.mubr.f32.gmra.mrb[26].mxu0 %v293_v23 }
  0xb5   : > { %492 = vmatprep.mubr.f32.mxu0 %v1536_v0 }
  0xb8   : > { %493 = vmatmul.mubr.f32.gmra.mrb[28].mxu0 %v294_v24 }
  0xb9   : > { %498 = vmatprep.mubr.f32.mxu0 %v1536_v0 }
  0xbc   : > { %499 = vmatmul.mubr.f32.gmra.mrb[30].mxu0 %v295_v25 }
 0x153   : > { %v410_v28 = vpop.f32.mrb[0].mxu0 }
 0x154   : > { %v412_v29 = vpop.f32.mrb[1].mxu0  ;;  %v653_v31 = vsel %vm652_vm0, 1.0, %v410_v28 }
 0x155   : > { %749 = vst [vmem:[%s1772_s24] sm:$0xff] %v412_v29 }
 0x157   : > { %v416_v30 = vpop.f32.mrb[2].mxu0 }
 0x158   : > { %v654_v0 = vsel %vm652_vm0, 1.0, %v416_v30  ;;  %v418_v32 = vpop.f32.mrb[3].mxu0 }
 0x159   : > { %v1068_v33 = vpack.c.bf16 %v654_v0, %v653_v31  ;;  %750 = vst [vmem:[%s1772_s24 + $0x8] sm:$0xff] %v418_v32  ;;  %v1178_v37 = vpop.f32.mrb[0].mxu1 }
 0x15a   : > { %v773_v39 = vadd.f32 %v1178_v37, %v1787_v36  ;;  %v571_v40 = vpop.f32.mrb[1].mxu1 }
 0x15b   : > { %1069 = vst [vmem:[%s1781_s15] sm:$0xff] %v1068_v33   ;;  %v422_v34 = vpop.f32.mrb[4].mxu0  ;;  %v772_v44 = vadd.f32 %v1787_v36, %v571_v40 }
 0x15c   : > { %v424_v35 = vpop.f32.mrb[5].mxu0  ;;  %v655_v41 = vsel %vm652_vm0, 1.0, %v422_v34  ;;  %789 = vst [vmem:[%s1798_s16 + $0x8] sm:$0xff] %v773_v39 }
 0x15d   : > { %751 = vst [vmem:[%s1772_s24 + $0x10] sm:$0xff] %v424_v35  ;;  %788 = vst [vmem:[%s1798_s16] sm:$0xff] %v772_v44  ;;  %v1181_v46 = vpop.f32.mrb[2].mxu1 }
 0x15e   : > { %v775_v48 = vadd.f32 %v1181_v46, %v1787_v36  ;;  %v581_v49 = vpop.f32.mrb[3].mxu1 }
 0x15f   : > { %v428_v38 = vpop.f32.mrb[6].mxu0  ;;  %v774_v51 = vadd.f32 %v1787_v36, %v581_v49 }
 0x160   : > { %v656_v42 = vsel %vm652_vm0, 1.0, %v428_v38  ;;  %v430_v43 = vpop.f32.mrb[7].mxu0  ;;  %791 = vst [vmem:[%s1798_s16 + $0x18] sm:$0xff] %v775_v48 }
 0x161   : > { %v1073_v45 = vpack.c.bf16 %v656_v42, %v655_v41  ;;  %752 = vst [vmem:[%s1772_s24 + $0x18] sm:$0xff] %v430_v43  ;;  %790 = vst [vmem:[%s1798_s16 + $0x10] sm:$0xff] %v774_v51  ;;  %v1184_v52 = vpop.f32.mrb[4].mxu1 }
 0x162   : > { %v777_v54 = vadd.f32 %v1184_v52, %v1787_v36  ;;  %v591_v55 = vpop.f32.mrb[5].mxu1 }
 0x163   : > { %1105 = vst [vmem:[%s1781_s15 + $0x8] sm:$0xff] %v1073_v45   ;;  %v434_v47 = vpop.f32.mrb[8].mxu0  ;;  %v776_v59 = vadd.f32 %v1787_v36, %v591_v55 }
 0x164   : > { %v436_v50 = vpop.f32.mrb[9].mxu0  ;;  %v657_v56 = vsel %vm652_vm0, 1.0, %v434_v47  ;;  %793 = vst [vmem:[%s1798_s16 + $0x28] sm:$0xff] %v777_v54 }
 0x165   : > { %753 = vst [vmem:[%s1772_s24 + $0x20] sm:$0xff] %v436_v50  ;;  %792 = vst [vmem:[%s1798_s16 + $0x20] sm:$0xff] %v776_v59  ;;  %v1187_v61 = vpop.f32.mrb[6].mxu1 }
 0x166   : > { %v779_v63 = vadd.f32 %v1187_v61, %v1787_v36  ;;  %v601_v1 = vpop.f32.mrb[7].mxu1 }
 0x167   : > { %v440_v53 = vpop.f32.mrb[10].mxu0  ;;  %v778_v3 = vadd.f32 %v1787_v36, %v601_v1 }
 0x168   : > { %v658_v57 = vsel %vm652_vm0, 1.0, %v440_v53  ;;  %v442_v58 = vpop.f32.mrb[11].mxu0  ;;  %795 = vst [vmem:[%s1798_s16 + $0x38] sm:$0xff] %v779_v63 }
 0x169   : > { %v1078_v60 = vpack.c.bf16 %v658_v57, %v657_v56  ;;  %754 = vst [vmem:[%s1772_s24 + $0x28] sm:$0xff] %v442_v58  ;;  %794 = vst [vmem:[%s1798_s16 + $0x30] sm:$0xff] %v778_v3  ;;  %v1190_v4 = vpop.f32.mrb[8].mxu1 }
 0x16a   : > { %v781_v6 = vadd.f32 %v1190_v4, %v1787_v36  ;;  %v611_v7 = vpop.f32.mrb[9].mxu1 }
 0x16b   : > { %1106 = vst [vmem:[%s1781_s15 + $0x10] sm:$0xff] %v1078_v60   ;;  %v446_v62 = vpop.f32.mrb[12].mxu0  ;;  %v780_v11 = vadd.f32 %v1787_v36, %v611_v7 }
 0x16c   : > { %v448_v2 = vpop.f32.mrb[13].mxu0  ;;  %v659_v8 = vsel %vm652_vm0, 1.0, %v446_v62  ;;  %797 = vst [vmem:[%s1798_s16 + $0x48] sm:$0xff] %v781_v6 }
 0x16d   : > { %755 = vst [vmem:[%s1772_s24 + $0x30] sm:$0xff] %v448_v2  ;;  %796 = vst [vmem:[%s1798_s16 + $0x40] sm:$0xff] %v780_v11  ;;  %v1193_v13 = vpop.f32.mrb[10].mxu1 }
 0x16e   : > { %v783_v15 = vadd.f32 %v1193_v13, %v1787_v36  ;;  %v621_v16 = vpop.f32.mrb[11].mxu1 }
 0x16f   : > { %v452_v5 = vpop.f32.mrb[14].mxu0  ;;  %v782_v18 = vadd.f32 %v1787_v36, %v621_v16 }
 0x170   : > { %v660_v9 = vsel %vm652_vm0, 1.0, %v452_v5  ;;  %v454_v10 = vpop.f32.mrb[15].mxu0  ;;  %799 = vst [vmem:[%s1798_s16 + $0x58] sm:$0xff] %v783_v15 }
 0x171   : > { %v1083_v12 = vpack.c.bf16 %v660_v9, %v659_v8  ;;  %756 = vst [vmem:[%s1772_s24 + $0x38] sm:$0xff] %v454_v10  ;;  %798 = vst [vmem:[%s1798_s16 + $0x50] sm:$0xff] %v782_v18  ;;  %v1196_v19 = vpop.f32.mrb[12].mxu1 }
 0x172   : > { %v785_v21 = vadd.f32 %v1196_v19, %v1787_v36  ;;  %v631_v22 = vpop.f32.mrb[13].mxu1 }
 0x173   : > { %1107 = vst [vmem:[%s1781_s15 + $0x18] sm:$0xff] %v1083_v12   ;;  %v458_v14 = vpop.f32.mrb[16].mxu0  ;;  %v784_v26 = vadd.f32 %v1787_v36, %v631_v22 }
 0x174   : > { %v460_v17 = vpop.f32.mrb[17].mxu0  ;;  %v661_v23 = vsel %vm652_vm0, 1.0, %v458_v14  ;;  %801 = vst [vmem:[%s1798_s16 + $0x68] sm:$0xff] %v785_v21 }
 0x175   : > { %757 = vst [vmem:[%s1772_s24 + $0x40] sm:$0xff] %v460_v17  ;;  %800 = vst [vmem:[%s1798_s16 + $0x60] sm:$0xff] %v784_v26  ;;  %v1199_v29 = vpop.f32.mrb[14].mxu1 }
 0x176   : > { %v787_v31 = vadd.f32 %v1199_v29, %v1787_v36  ;;  %v641_v0 = vpop.f32.mrb[15].mxu1 }
 0x177   : > { %v464_v20 = vpop.f32.mrb[18].mxu0  ;;  %v786_v33 = vadd.f32 %v1787_v36, %v641_v0 }
 0x178   : > { %v662_v24 = vsel %vm652_vm0, 1.0, %v464_v20  ;;  %v466_v25 = vpop.f32.mrb[19].mxu0  ;;  %803 = vst [vmem:[%s1798_s16 + $0x78] sm:$0xff] %v787_v31 }
 0x179   : > { %v1088_v28 = vpack.c.bf16 %v662_v24, %v661_v23  ;;  %758 = vst [vmem:[%s1772_s24 + $0x48] sm:$0xff] %v466_v25  ;;  %802 = vst [vmem:[%s1798_s16 + $0x70] sm:$0xff] %v786_v33 }
 0x17b   : > { %1108 = vst [vmem:[%s1781_s15 + $0x20] sm:$0xff] %v1088_v28   ;;  %v470_v30 = vpop.f32.mrb[20].mxu0 }
 0x17c   : > { %v472_v32 = vpop.f32.mrb[21].mxu0  ;;  %v663_v35 = vsel %vm652_vm0, 1.0, %v470_v30 }
 0x17d   : > { %759 = vst [vmem:[%s1772_s24 + $0x50] sm:$0xff] %v472_v32 }
 0x17f   : > { %v476_v34 = vpop.f32.mrb[22].mxu0 }
 0x180   : > { %v664_v37 = vsel %vm652_vm0, 1.0, %v476_v34  ;;  %v478_v38 = vpop.f32.mrb[23].mxu0 }
 0x181   : > { %v1093_v39 = vpack.c.bf16 %v664_v37, %v663_v35  ;;  %760 = vst [vmem:[%s1772_s24 + $0x58] sm:$0xff] %v478_v38 }
 0x183   : > { %1109 = vst [vmem:[%s1781_s15 + $0x28] sm:$0xff] %v1093_v39   ;;  %v482_v36 = vpop.f32.mrb[24].mxu0 }
 0x184   : > { %v484_v40 = vpop.f32.mrb[25].mxu0  ;;  %v665_v42 = vsel %vm652_vm0, 1.0, %v482_v36 }
 0x185   : > { %761 = vst [vmem:[%s1772_s24 + $0x60] sm:$0xff] %v484_v40 }
 0x187   : > { %v488_v41 = vpop.f32.mrb[26].mxu0 }
 0x188   : > { %v666_v43 = vsel %vm652_vm0, 1.0, %v488_v41  ;;  %v490_v44 = vpop.f32.mrb[27].mxu0 }
 0x189   : > { %v1098_v45 = vpack.c.bf16 %v666_v43, %v665_v42  ;;  %762 = vst [vmem:[%s1772_s24 + $0x68] sm:$0xff] %v490_v44 }
 0x18b   : > { %1110 = vst [vmem:[%s1781_s15 + $0x30] sm:$0xff] %v1098_v45   ;;  %v494_v46 = vpop.f32.mrb[28].mxu0 }
 0x18c   : > { %v496_v47 = vpop.f32.mrb[29].mxu0  ;;  %v667_v49 = vsel %vm652_vm0, 1.0, %v494_v46 }
 0x18d   : > { %763 = vst [vmem:[%s1772_s24 + $0x70] sm:$0xff] %v496_v47 }
 0x18f   : > { %v500_v48 = vpop.f32.mrb[30].mxu0 }
 0x190   : > { %v668_v50 = vsel %vm652_vm0, 1.0, %v500_v48  ;;  %v502_v51 = vpop.f32.mrb[31].mxu0 }
 0x191   : > { %v1103_v52 = vpack.c.bf16 %v668_v50, %v667_v49  ;;  %764 = vst [vmem:[%s1772_s24 + $0x78] sm:$0xff] %v502_v51 }
 0x192   : > { %1411 = shalt.err (!%p1408_p7)
}
 0x193   : > { %s1412_s24 = scalar_lea.hbm %s1875_s29, 2048  ;;  %s1416_s16 = scalar_lea.hbm %s2000_s4, 4096 }
 0x194   : > { %p1413_p9 = scmp.ne.s32.totalorder %s1875_s29, %s1412_s24  ;;  %p1417_p5 = scmp.lt.u32.totalorder %s1875_s29, %s2000_s4 }
 0x195   : > { %p1418_p11 = scmp.lt.u32.totalorder %s1416_s16, %s1412_s24  ;;  %p1420_p4 = scmp.lt.u32.totalorder %s1412_s24, %s1875_s29 }
 0x196   : > { %p1414_p2 = pnand %p1413_p9, %p1667_p12 }
 0x197   : > { %p1419_p1 = por %p1418_p11, %p1417_p5 }
 0x198   : > { %p1415_p0 = pneg %p1414_p2 }
 0x199   : > { %p1421_p6 = por %p1420_p4, %p1419_p1 }
 0x19b   : > { %p1422_p8 = pnand %p1421_p6, %p1415_p0 }
 0x19d   : > { %1425 = shalt.err (!%p1422_p8)
}
 0x19e   : > { %s1538_s0 = smov 128   ;;  %s1539_s27 = smov 8   ;;  %1111 = vst [vmem:[%s1781_s15 + $0x38] sm:$0xff] %v1103_v52  }
 0x19f   : > { %1271 = dma.vmem_to_hbm [thread:$0]  (%p1667_p12), %s1878_s17, 2048, %s1875_s29, %s1899_s13, %s1538_s0, %s1538_s0, %s1539_s27  }
 0x1a0   : > { %s1426_s7 = scalar_lea.vmem %s1891_s11, 2048  ;;  %s1540_s24 = smov [#allocation10]  }
 0x1a1   : > { %p1427_p10 = scmp.ne.s32.totalorder %s1891_s11, %s1426_s7  ;;  %s1430_s28 = sshll.u32 %s1540_s24, 4  ;;  %s1431_s28 = int_to_ptr.vmem [resolvable:$false] %s1430_s28 }
 0x1a2   : > { %s1432_s26 = scalar_lea.vmem %s1431_s28, 4096  ;;  %p1433_p7 = scmp.lt.s32.totalorder %s1891_s11, %s1431_s28 }
 0x1a3   : > { %p1428_p13 = pnand %p1427_p10, %p1667_p12  ;;  %p1434_p9 = scmp.lt.s32.totalorder %s1432_s26, %s1426_s7 }
 0x1a5   : > { %p1429_p3 = pneg %p1428_p13  ;;  %p1435_p2 = por %p1434_p9, %p1433_p7 }
 0x1a7   : > { %p1436_p0 = pnand %p1435_p2, %p1429_p3 }
 0x1a9   : > { %1439 = shalt.err (!%p1436_p0)
}
 0x1aa   : > { %s1440_s15 = scalar_lea.hbm %s1885_s23, 2048  ;;  %s1444_s16 = scalar_lea.hbm %s2001_s5, 4096 }
 0x1ab   : > { %p1441_p5 = scmp.ne.s32.totalorder %s1885_s23, %s1440_s15  ;;  %p1445_p4 = scmp.lt.u32.totalorder %s1885_s23, %s2001_s5 }
 0x1ac   : > { %p1446_p6 = scmp.lt.u32.totalorder %s1444_s16, %s1440_s15  ;;  %p1448_p10 = scmp.lt.u32.totalorder %s1440_s15, %s1885_s23 }
 0x1ad   : > { %p1442_p11 = pnand %p1441_p5, %p1667_p12 }
 0x1ae   : > { %p1447_p8 = por %p1446_p6, %p1445_p4 }
 0x1af   : > { %p1443_p1 = pneg %p1442_p11 }
 0x1b0   : > { %p1449_p13 = por %p1448_p10, %p1447_p8 }
 0x1b2   : > { %p1450_p3 = pnand %p1449_p13, %p1443_p1 }
 0x1b4   : > { %1453 = shalt.err (!%p1450_p3)
}
 0x1b5   : > { %1272 = dma.vmem_to_hbm [thread:$0]  (%p1667_p12), %s1891_s11, 2048, %s1885_s23, %s1899_s13, %s1538_s0, %s1538_s0, %s1539_s27  }
 0x1b6   : > { %s805_s7 = scalar_lea.sflag [#allocation4], %s1715_s12  ;;  %s1454_s24 = scalar_lea.vmem %s1869_s14, 1024 }
 0x1b7   : > { %p1455_p7 = scmp.ne.s32.totalorder %s1869_s14, %s1454_s24  ;;  %s1541_s28 = smov [#allocation7]  }
 0x1b8   : > { %s1458_s26 = sshll.u32 %s1541_s28, 4  ;;  %s1459_s26 = int_to_ptr.vmem [resolvable:$false] %s1458_s26 }
 0x1b9   : > { %p1456_p9 = pnand %p1455_p7, %p1667_p12  ;;  %s1460_s15 = scalar_lea.vmem %s1459_s26, 2048 }
 0x1ba   : > { %p1461_p0 = scmp.lt.s32.totalorder %s1869_s14, %s1459_s26  ;;  %p1462_p5 = scmp.lt.s32.totalorder %s1460_s15, %s1454_s24 }
 0x1bb   : > { %p1457_p2 = pneg %p1456_p9 }
 0x1bc   : > { %p1463_p11 = por %p1462_p5, %p1461_p0 }
 0x1be   : > { %p1464_p1 = pnand %p1463_p11, %p1457_p2 }
 0x1c0   : > { %1467 = shalt.err (!%p1464_p1)
}
 0x1c1   : > { %s1468_s23 = scalar_lea.hbm %s1897_s8, 1024  ;;  %s1472_s0 = scalar_lea.hbm %s1999_s3, 2048 }
 0x1c2   : > { %p1469_p4 = scmp.ne.s32.totalorder %s1897_s8, %s1468_s23  ;;  %p1473_p10 = scmp.lt.u32.totalorder %s1897_s8, %s1999_s3 }
 0x1c3   : > { %p1474_p13 = scmp.lt.u32.totalorder %s1472_s0, %s1468_s23  ;;  %p1476_p7 = scmp.lt.u32.totalorder %s1468_s23, %s1897_s8 }
 0x1c4   : > { %p1470_p6 = pnand %p1469_p4, %p1667_p12 }
 0x1c5   : > { %p1475_p3 = por %p1474_p13, %p1473_p10 }
 0x1c6   : > { %p1471_p8 = pneg %p1470_p6 }
 0x1c7   : > { %p1477_p9 = por %p1476_p7, %p1475_p3 }
 0x1c9   : > { %p1478_p2 = pnand %p1477_p9, %p1471_p8 }
 0x1cb   : > { %1481 = shalt.err (!%p1478_p2)
}
 0x1cc   : > { %s1542_s29 = smov 64   ;;  %s1543_s16 = smov 4  }
 0x1cd   : > { %1270 = dma.vmem_to_hbm [thread:$0]  (%p1667_p12), %s1869_s14, 1024, %s1897_s8, %s805_s7, %s1542_s29, %s1542_s29, %s1543_s16  }
 0x1ce PF: > { %s875_s22 = sand.u32 1, %s1516_s18   ;;  %p2019_p0 = scmp.ne.s32.totalorder %s2008_s25, 0 }
 0x1cf   : > { %p2020_p5 = scmp.ge.s32.totalorder %s1528_s21, 2  ;;  %s876_s6 = scalar_lea.sflag [#allocation4], %s875_s22 }
 0x1d1   : > { %p1285_p11 = pnand %p2020_p5, %p2019_p0 }
 0x1d3   : > { %1507 = dma.done.wait (!%p1285_p11), %s876_s6, 1024  }
 0x1d4   : > { %1509 = vsyncadd (!%p1285_p11), %s876_s6, 4294966272  ;;  %s2021_s24 = sadd.s32 4294967294, %s1528_s21  }
 0x1d5   : > { %s884_s28 = sand.u32 1, %s2021_s24  }
 0x1d6   : > { %s885_s26 = scalar_lea.sflag [#allocation9], %s884_s28 }
 0x1d7   : > { %1511 = dma.done.wait (!%p1285_p11), %s885_s26, 4096  }
 0x1d8   : > { %1513 = vsyncadd (!%p1285_p11), %s885_s26, 4294963200  ;;  %p23_p12 = scmp.ge.s32.totalorder %s1632_s30, 4   ;;  %s2022_s18 = smov %s1520_s19 }
 0x1d9   : > { %s2023_s19 = smov %s1524_s20  ;;  %s2024_s20 = smov %s1663_s9 }
 0x1da   : > { %s2025_s21 = smov %s1632_s30  ;;  %25 = sbr.rel (!%p23_p12) target bundleno = 10 (0xa), region = 113 }
 0x1e1   :  { %899 = vsyncpa [#allocation3], 1 }
 0x1e2   :  { %901 = vsyncpa [#allocation3 + $0x1], 1 }
 0x1e3   :  { %902 = vsyncpa [#allocation6], 1 }
 0x1e4   :  { %903 = vsyncpa [#allocation4], 1 }
 0x1e5   :  { %905 = vsyncpa [#allocation4 + $0x1], 1 }
 0x1e6   :  { %906 = vsyncpa [#allocation9], 1 }
 0x1e7   :  { %908 = vsyncpa [#allocation9 + $0x1], 1 }

</bundles_post_ra>
